<compile_context>
chip_gen: v7x
topology: tpu7x:2x2x1
jax: 0.10.0
libtpu: 0.0.40
codegen_flags: <defaults>
</compile_context>

<pallas_src>
import functools

import jax
import jax.numpy as jnp
from jax.experimental import pallas as pl
from jax.experimental.pallas import tpu as pltpu


def _round_up(x, m):
    return (x + m - 1) // m * m


def _cnn_kernel(x_ref, lim_ref, wc_ref, bc_ref, wf_ref, bf_ref, o_ref, xcol_ref,
                *, kernel_size, c_in_pad, l_out, l_pad, n_cols):
    """One grid step == one tile of TB batch elements.

    x_ref    : VMEM (1, C_in_pad, W_slab)  channel-major, per-element zero-padded slab
    lim_ref  : VMEM (1, TB, 1) int32       min(valid length, L_out) per tile element
    wc_ref   : VMEM (C_out, K*C_in_pad)    conv weight in im2col (tap-major) layout
    bc_ref   : VMEM (C_out, 1)             conv bias
    wf_ref   : VMEM (C_out, F_pad)         fc weight (transposed), zero-padded lanes
    bf_ref   : VMEM (1, F_pad)             fc bias, zero-padded lanes
    o_ref    : VMEM (1, TB, F_pad)         lane-dense output tile
    xcol_ref : VMEM (K*C_in_pad, n_cols)   im2col scratch (fully rewritten every step)
    """
    tb = lim_ref.shape[1]

    # Build the im2col matrix for the whole batch tile with aligned full-block stores:
    #   xcol[k*C_in_pad + ci, p] = x_slab[ci, p + k]
    x2 = x_ref[0]                                        # (C_in_pad, W_slab)
    for k in range(kernel_size):                         # static unroll over taps
        xcol_ref[k * c_in_pad:(k + 1) * c_in_pad, :] = x2[:, k:k + n_cols]

    # Conv1d over the whole tile as a single MXU matmul, then bias + ReLU.
    acc = jnp.dot(wc_ref[...], xcol_ref[...], preferred_element_type=jnp.float32)
    acc = jnp.maximum(acc + bc_ref[...], 0.0)            # (C_out, n_cols); relu(0)=0 keeps mask

    # Masked AdaptiveAvgPool1d(1) folded into a second matmul.
    #   pool[t, p] = 1/L_out  iff  p in [t*L_pad, t*L_pad + min(len_t, L_out)),  else 0.
    # Junk columns (conv windows straddling elements, slab padding) are excluded.
    lim = lim_ref[0]                                     # (TB, 1) int32
    lower = jax.lax.broadcasted_iota(jnp.int32, (tb, 1), 0) * l_pad
    upper = lower + lim
    p = jax.lax.broadcasted_iota(jnp.int32, (tb, n_cols), 1)
    pool = jnp.where((p >= lower) & (p < upper),
                     jnp.float32(1.0 / l_out), jnp.float32(0.0))       # (TB, n_cols)

    # pooled[t, c] = sum_p pool[t, p] * acc[c, p]   (contract on the shared lane axis)
    pooled = jax.lax.dot_general(pool, acc, (((1,), (1,)), ((), ())),
                                 preferred_element_type=jnp.float32)   # (TB, C_out)

    # Linear for the whole tile: (TB, C_out) @ (C_out, F_pad) + bias. Lane-dense store.
    o_ref[0] = (jnp.dot(pooled, wf_ref[...], preferred_element_type=jnp.float32)
                + bf_ref[...])


def one_dim_cnn_forward(x, params, list_length=None, *, batch_tile=None):
    w_conv, b_conv, w_fc, b_fc = params
    B, C_in, L = x.shape
    C_out, _, K = w_conv.shape
    F = w_fc.shape[0]
    pad = (K - 1) // 2
    L_out = L + 2 * pad - K + 1
    L_pad = L + 2 * pad

    # ---- batch tiling: ~1024 lanes per step, multiple of 8 when possible ----
    if batch_tile is None:
        batch_tile = max(1, min(B, 1024 // max(1, L_pad)))
        if batch_tile >= 8:
            batch_tile -= batch_tile % 8
    TB = batch_tile
    G = (B + TB - 1) // TB
    B_pad = G * TB

    C_in_pad = _round_up(C_in, 8)                # sublane-aligned channel axis
    n_cols = _round_up(TB * L_pad, 128)          # matmul N dim (lane-aligned)
    W_slab = _round_up(n_cols + K - 1, 128)      # input slab width (tap slices stay in-bounds)
    KC_pad = K * C_in_pad                        # contraction dim (multiple of 8 by construction)
    F_pad = _round_up(F, 128)                    # lane-dense output

    # ---- host-side repack of x: one fused pad+transpose+reshape pass ----
    xf = x.astype(jnp.float32)
    xf = jnp.pad(xf, ((0, B_pad - B), (0, C_in_pad - C_in), (pad, pad)))  # (B_pad,C_in_pad,L_pad)
    xp = xf.reshape(G, TB, C_in_pad, L_pad).transpose(0, 2, 1, 3)
    xp = xp.reshape(G, C_in_pad, TB * L_pad)
    xp = jnp.pad(xp, ((0, 0), (0, 0), (0, W_slab - TB * L_pad)))          # (G, C_in_pad, W_slab)

    # ---- weights: im2col layout + lane/sublane padding ----
    wc = jnp.transpose(w_conv, (0, 2, 1)).astype(jnp.float32)             # (C_out, K, C_in)
    wc = jnp.pad(wc, ((0, 0), (0, 0), (0, C_in_pad - C_in)))
    wc = wc.reshape(C_out, KC_pad)                                        # (C_out, K*C_in_pad)
    bc = b_conv.reshape(C_out, 1).astype(jnp.float32)
    wf = jnp.transpose(w_fc, (1, 0)).astype(jnp.float32)                  # (C_out, F)
    wf = jnp.pad(wf, ((0, 0), (0, F_pad - F)))                            # (C_out, F_pad)
    bf = jnp.pad(b_fc.astype(jnp.float32).reshape(1, F), ((0, 0), (0, F_pad - F)))

    # ---- valid lengths, clamped to L_out on the host ----
    if list_length is None:
        lim = jnp.full((B_pad,), L_out, dtype=jnp.int32)
    else:
        lens = jnp.asarray(list_length, dtype=jnp.int32).reshape(B)
        lim = jnp.minimum(lens, L_out)
        if B_pad != B:
            lim = jnp.pad(lim, (0, B_pad - B))
    lim = lim.reshape(G, TB, 1)

    kernel = functools.partial(_cnn_kernel, kernel_size=K, c_in_pad=C_in_pad,
                               l_out=L_out, l_pad=L_pad, n_cols=n_cols)

    out = pl.pallas_call(
        kernel,
        out_shape=jax.ShapeDtypeStruct((G, TB, F_pad), jnp.float32),
        grid_spec=pltpu.PrefetchScalarGridSpec(
            num_scalar_prefetch=0,
            grid=(G,),
            in_specs=[
                pl.BlockSpec((1, C_in_pad, W_slab), lambda g: (g, 0, 0)),
                pl.BlockSpec((1, TB, 1), lambda g: (g, 0, 0)),
                pl.BlockSpec((C_out, KC_pad), lambda g: (0, 0)),
                pl.BlockSpec((C_out, 1), lambda g: (0, 0)),
                pl.BlockSpec((C_out, F_pad), lambda g: (0, 0)),
                pl.BlockSpec((1, F_pad), lambda g: (0, 0)),
            ],
            out_specs=pl.BlockSpec((1, TB, F_pad), lambda g: (g, 0, 0)),
            scratch_shapes=[pltpu.VMEM((KC_pad, n_cols), jnp.float32)],
        ),
        compiler_params=pltpu.CompilerParams(
            dimension_semantics=("parallel",)),   # batch tiles are independent (v7x: 2 TCs)
    )(xp, lim, wc, bc, wf, bf)

    return out.reshape(B_pad, F_pad)[:B, :F]


def init_params(key, in_channels, out_channels, kernel_size, feature_size):
    """Deterministic PyTorch-style uniform init (same shapes as nn.Conv1d / nn.Linear)."""
    k1, k2, k3, k4 = jax.random.split(key, 4)
    conv_bound = 1.0 / (in_channels * kernel_size) ** 0.5
    fc_bound = 1.0 / out_channels ** 0.5
    w_conv = jax.random.uniform(k1, (out_channels, in_channels, kernel_size),
                                jnp.float32, -conv_bound, conv_bound)
    b_conv = jax.random.uniform(k2, (out_channels,), jnp.float32, -conv_bound, conv_bound)
    w_fc = jax.random.uniform(k3, (feature_size, out_channels), jnp.float32,
                              -fc_bound, fc_bound)
    b_fc = jax.random.uniform(k4, (feature_size,), jnp.float32, -fc_bound, fc_bound)
    return w_conv, b_conv, w_fc, b_fc


def reference_forward(x, params, list_length=None):
    """Pure-JAX reference mirroring the PyTorch forward."""
    w_conv, b_conv, w_fc, b_fc = params
    B, C_in, L = x.shape
    C_out, _, K = w_conv.shape
    pad = (K - 1) // 2
    L_out = L + 2 * pad - K + 1
    xp = jnp.pad(x.astype(jnp.float32), ((0, 0), (0, 0), (pad, pad)))
    conv = jnp.zeros((B, C_out, L_out), jnp.float32)
    for k in range(K):
        conv = conv + jnp.einsum('oi,bil->bol', w_conv[:, :, k], xp[:, :, k:k + L_out])
    conv = conv + b_conv[None, :, None]
    if list_length is not None:
        pos = jnp.arange(L_out)[None, None, :]
        conv = jnp.where(pos < jnp.asarray(list_length)[:, None, None], conv, 0.0)
    conv = jnp.maximum(conv, 0.0)
    pooled = jnp.mean(conv, axis=-1)
    return pooled @ w_fc.T + b_fc


if __name__ == "__main__":
    # Small shapes consistent with the module: B=2, in_channels=4, L=16,
    # out_channels=8, kernel_size=3, feature_size=32.
    B, C_in, L = 2, 4, 16
    C_out, K, F = 8, 3, 32

    key = jax.random.PRNGKey(0)
    kx, kp = jax.random.split(key)
    x = jax.random.normal(kx, (B, C_in, L), jnp.float32)
    params = init_params(kp, C_in, C_out, K, F)
    list_length = jnp.array([16, 10], dtype=jnp.int32)   # exercise the masking path too

    out = jax.block_until_ready(one_dim_cnn_forward(x, params, list_length))
    ref = reference_forward(x, params, list_length)
    assert out.shape == (B, F)
    assert jnp.allclose(out, ref, atol=1e-4, rtol=1e-4), (out, ref)

    # Also the default (list_length=None) path.
    out2 = jax.block_until_ready(one_dim_cnn_forward(x, params))
    ref2 = reference_forward(x, params)
    assert jnp.allclose(out2, ref2, atol=1e-4, rtol=1e-4)

    print("KERNEL_OK")
</pallas_src>

<mosaic_0001>
module attributes {stable_mosaic.version = 11 : i64} {
  func.func @_cnn_kernel(%arg0: i32, %arg1: memref<1x8x256xf32, #tpu.memory_space<vmem>>, %arg2: memref<1x2x1xi32, #tpu.memory_space<vmem>>, %arg3: memref<8x24xf32, #tpu.memory_space<vmem>>, %arg4: memref<8x1xf32, #tpu.memory_space<vmem>>, %arg5: memref<8x128xf32, #tpu.memory_space<vmem>>, %arg6: memref<1x128xf32, #tpu.memory_space<vmem>>, %arg7: memref<1x2x128xf32, #tpu.memory_space<vmem>>, %arg8: memref<24x128xf32, #tpu.memory_space<vmem>>) attributes {dimension_semantics = [#tpu.dimension_semantics<parallel>], iteration_bounds = array<i64: 1>, scalar_prefetch = 0 : i64, scratch_operands = 1 : i64, tpu.core_type = #tpu.core_type<tc>, window_params = [{transform_indices = @transform_0, window_bounds = array<i64: 1, 8, 256>}, {transform_indices = @transform_1, window_bounds = array<i64: 1, 2, 1>}, {pipeline_mode = #tpu.pipeline_mode<synchronous>, transform_indices = @transform_2, window_bounds = array<i64: 8, 24>}, {pipeline_mode = #tpu.pipeline_mode<synchronous>, transform_indices = @transform_3, window_bounds = array<i64: 8, 1>}, {pipeline_mode = #tpu.pipeline_mode<synchronous>, transform_indices = @transform_4, window_bounds = array<i64: 8, 128>}, {pipeline_mode = #tpu.pipeline_mode<synchronous>, transform_indices = @transform_5, window_bounds = array<i64: 1, 128>}, {transform_indices = @transform_6, window_bounds = array<i64: 1, 2, 128>}]} {
    %c0 = arith.constant 0 : index
    %c0_0 = arith.constant 0 : index
    %c0_1 = arith.constant 0 : index
    %0 = vector.load %arg1[%c0, %c0_0, %c0_1] : memref<1x8x256xf32, #tpu.memory_space<vmem>>, vector<1x8x256xf32>
    %1 = vector.shape_cast %0 : vector<1x8x256xf32> to vector<8x256xf32>
    %2 = vector.extract_strided_slice %1 {offsets = [0, 0], sizes = [8, 128], strides = [1, 1]} : vector<8x256xf32> to vector<8x128xf32>
    %c0_2 = arith.constant 0 : index
    %c0_3 = arith.constant 0 : index
    %3 = vector.load %arg8[%c0_2, %c0_3] : memref<24x128xf32, #tpu.memory_space<vmem>>, vector<8x128xf32>
    tpu.vector_store %arg8[%c0_2, %c0_3], %2 {strides = array<i32>} : memref<24x128xf32, #tpu.memory_space<vmem>>, vector<8x128xf32>,
    %4 = vector.extract_strided_slice %1 {offsets = [0, 1], sizes = [8, 128], strides = [1, 1]} : vector<8x256xf32> to vector<8x128xf32>
    %c8 = arith.constant 8 : index
    %c0_4 = arith.constant 0 : index
    %5 = vector.load %arg8[%c8, %c0_4] : memref<24x128xf32, #tpu.memory_space<vmem>>, vector<8x128xf32>
    tpu.vector_store %arg8[%c8, %c0_4], %4 {strides = array<i32>} : memref<24x128xf32, #tpu.memory_space<vmem>>, vector<8x128xf32>,
    %6 = vector.extract_strided_slice %1 {offsets = [0, 2], sizes = [8, 128], strides = [1, 1]} : vector<8x256xf32> to vector<8x128xf32>
    %c16 = arith.constant 16 : index
    %c0_5 = arith.constant 0 : index
    %7 = vector.load %arg8[%c16, %c0_5] : memref<24x128xf32, #tpu.memory_space<vmem>>, vector<8x128xf32>
    tpu.vector_store %arg8[%c16, %c0_5], %6 {strides = array<i32>} : memref<24x128xf32, #tpu.memory_space<vmem>>, vector<8x128xf32>,
    %c0_6 = arith.constant 0 : index
    %c0_7 = arith.constant 0 : index
    %8 = vector.load %arg3[%c0_6, %c0_7] : memref<8x24xf32, #tpu.memory_space<vmem>>, vector<8x24xf32>
    %c0_8 = arith.constant 0 : index
    %c0_9 = arith.constant 0 : index
    %9 = vector.load %arg8[%c0_8, %c0_9] : memref<24x128xf32, #tpu.memory_space<vmem>>, vector<24x128xf32>
    %cst = arith.constant dense<0.000000e+00> : vector<8x128xf32>
    %10 = tpu.matmul %8, %9, %cst {dimension_numbers = #tpu.dot_dimension_numbers<[1], [0], [0], [1], [0, 0, 1, 1], [], []>} : vector<8x24xf32>, vector<24x128xf32>, vector<8x128xf32> -> vector<8x128xf32>
    %c0_10 = arith.constant 0 : index
    %c0_11 = arith.constant 0 : index
    %11 = vector.load %arg4[%c0_10, %c0_11] : memref<8x1xf32, #tpu.memory_space<vmem>>, vector<8x1xf32>
    %12 = vector.broadcast %11 : vector<8x1xf32> to vector<8x128xf32>
    %13 = arith.addf %10, %12 : vector<8x128xf32>
    %cst_12 = arith.constant 0.000000e+00 : f32
    %14 = vector.broadcast %cst_12 : f32 to vector<8x128xf32>
    %15 = arith.maximumf %13, %14 : vector<8x128xf32>
    %c0_13 = arith.constant 0 : index
    %c0_14 = arith.constant 0 : index
    %c0_15 = arith.constant 0 : index
    %16 = vector.load %arg2[%c0_13, %c0_14, %c0_15] : memref<1x2x1xi32, #tpu.memory_space<vmem>>, vector<1x2x1xi32>
    %17 = vector.shape_cast %16 : vector<1x2x1xi32> to vector<2x1xi32>
    %18 = tpu.iota {dimensions = array<i32: 0>} : vector<2x1xi32>
    %c18_i32 = arith.constant 18 : i32
    %19 = vector.broadcast %c18_i32 : i32 to vector<2x1xi32>
    %20 = arith.muli %18, %19 : vector<2x1xi32>
    %21 = arith.addi %20, %17 : vector<2x1xi32>
    %22 = tpu.iota {dimensions = array<i32: 1>} : vector<2x128xi32>
    %23 = vector.broadcast %20 : vector<2x1xi32> to vector<2x128xi32>
    %24 = arith.cmpi sge, %22, %23 : vector<2x128xi32>
    %25 = vector.broadcast %21 : vector<2x1xi32> to vector<2x128xi32>
    %26 = arith.cmpi slt, %22, %25 : vector<2x128xi32>
    %27 = arith.andi %24, %26 : vector<2x128xi1>
    %cst_16 = arith.constant 6.250000e-02 : f32
    %cst_17 = arith.constant 0.000000e+00 : f32
    %28 = vector.broadcast %cst_16 : f32 to vector<2x128xf32>
    %29 = vector.broadcast %cst_17 : f32 to vector<2x128xf32>
    %30 = arith.select %27, %28, %29 : vector<2x128xi1>, vector<2x128xf32>
    %cst_18 = arith.constant dense<0.000000e+00> : vector<2x8xf32>
    %31 = tpu.matmul %30, %15, %cst_18 {dimension_numbers = #tpu.dot_dimension_numbers<[1], [1], [0], [0], [0, 0, 1, 0], [], []>} : vector<2x128xf32>, vector<8x128xf32>, vector<2x8xf32> -> vector<2x8xf32>
    %c0_19 = arith.constant 0 : index
    %c0_20 = arith.constant 0 : index
    %32 = vector.load %arg5[%c0_19, %c0_20] : memref<8x128xf32, #tpu.memory_space<vmem>>, vector<8x128xf32>
    %cst_21 = arith.constant dense<0.000000e+00> : vector<2x128xf32>
    %33 = tpu.matmul %31, %32, %cst_21 {dimension_numbers = #tpu.dot_dimension_numbers<[1], [0], [0], [1], [0, 0, 1, 1], [], []>} : vector<2x8xf32>, vector<8x128xf32>, vector<2x128xf32> -> vector<2x128xf32>
    %c0_22 = arith.constant 0 : index
    %c0_23 = arith.constant 0 : index
    %34 = vector.load %arg6[%c0_22, %c0_23] : memref<1x128xf32, #tpu.memory_space<vmem>>, vector<1x128xf32>
    %35 = vector.broadcast %34 : vector<1x128xf32> to vector<2x128xf32>
    %36 = arith.addf %33, %35 : vector<2x128xf32>
    %c0_24 = arith.constant 0 : index
    %c0_25 = arith.constant 0 : index
    %c0_26 = arith.constant 0 : index
    %37 = vector.load %arg7[%c0_24, %c0_25, %c0_26] : memref<1x2x128xf32, #tpu.memory_space<vmem>>, vector<1x2x128xf32>
    %38 = vector.shape_cast %37 : vector<1x2x128xf32> to vector<2x128xf32>
    %39 = vector.shape_cast %36 : vector<2x128xf32> to vector<1x2x128xf32>
    tpu.vector_store %arg7[%c0_24, %c0_25, %c0_26], %39 {strides = array<i32>} : memref<1x2x128xf32, #tpu.memory_space<vmem>>, vector<1x2x128xf32>,
    return
  }
  func.func @transform_0(%arg0: i32) -> (i32, i32, i32) {
    %c0_i32 = arith.constant 0 : i32
    %c0_i32_0 = arith.constant 0 : i32
    %c0_i32_1 = arith.constant 0 : i32
    return %arg0, %c0_i32, %c0_i32_0 : i32, i32, i32
  }
  func.func @transform_1(%arg0: i32) -> (i32, i32, i32) {
    %c0_i32 = arith.constant 0 : i32
    %c0_i32_0 = arith.constant 0 : i32
    %c0_i32_1 = arith.constant 0 : i32
    return %arg0, %c0_i32, %c0_i32_0 : i32, i32, i32
  }
  func.func @transform_2(%arg0: i32) -> (i32, i32) {
    %c0_i32 = arith.constant 0 : i32
    %c0_i32_0 = arith.constant 0 : i32
    %c0_i32_1 = arith.constant 0 : i32
    return %c0_i32, %c0_i32_0 : i32, i32
  }
  func.func @transform_3(%arg0: i32) -> (i32, i32) {
    %c0_i32 = arith.constant 0 : i32
    %c0_i32_0 = arith.constant 0 : i32
    %c0_i32_1 = arith.constant 0 : i32
    return %c0_i32, %c0_i32_0 : i32, i32
  }
  func.func @transform_4(%arg0: i32) -> (i32, i32) {
    %c0_i32 = arith.constant 0 : i32
    %c0_i32_0 = arith.constant 0 : i32
    %c0_i32_1 = arith.constant 0 : i32
    return %c0_i32, %c0_i32_0 : i32, i32
  }
  func.func @transform_5(%arg0: i32) -> (i32, i32) {
    %c0_i32 = arith.constant 0 : i32
    %c0_i32_0 = arith.constant 0 : i32
    %c0_i32_1 = arith.constant 0 : i32
    return %c0_i32, %c0_i32_0 : i32, i32
  }
  func.func @transform_6(%arg0: i32) -> (i32, i32, i32) {
    %c0_i32 = arith.constant 0 : i32
    %c0_i32_0 = arith.constant 0 : i32
    %c0_i32_1 = arith.constant 0 : i32
    return %arg0, %c0_i32, %c0_i32_0 : i32, i32, i32
  }
}

</mosaic_0001>

<bundles_post_ra>
// kernel: tpu_custom_call.1
= control target key start
LH: loop header
LB: loop body
LE: loop exit
PB: predicated region body
PF: predicated region fallthrough
CT: control target
= control target key end

     0   :  { %11 = vsyncpa [#allocation4], 0  ;;  %s508_s0 = inlined_call_operand.hbm [shape: f32[1,8,256], index: 0, kind: input, shape index: {}]   ;;  %s509_s1 = inlined_call_operand.vmem [shape: s32[1,2,1], index: 1, kind: input, shape index: {}]   ;;  %s510_s2 = inlined_call_operand.vmem [shape: f32[8,24], index: 2, kind: input, shape index: {}]   ;;  %s511_s3 = inlined_call_operand.vmem [shape: f32[8,1], index: 3, kind: input, shape index: {}]   ;;  %s512_s4 = inlined_call_operand.vmem [shape: f32[8,128], index: 4, kind: input, shape index: {}]   ;;  %s513_s5 = inlined_call_operand.vmem [shape: f32[1,128], index: 5, kind: input, shape index: {}]   ;;  %s514_s6 = inlined_call_operand.hbm [shape: f32[1,2,128], index: 6, kind: output, shape index: {}]  }
   0x1   :  { %12 = vsyncpa [#allocation5], 0  ;;  %s422_s21 = smov [#allocation3]   ;;  %s374_s25 = scalar_lea.hbm %s508_s0, 256 }
   0x2   :  { %s19_s22 = sshll.u32 %s422_s21, 4  ;;  %p375_p0 = scmp.ne.s32.totalorder %s508_s0, %s374_s25  ;;  %s20_s22 = int_to_ptr.vmem [resolvable:$true] %s19_s22 }
   0x3   :  { %p378_p1 = scmp.lt.u32.totalorder %s374_s25, %s508_s0 }
   0x5   :  { %p380_p2 = pnand %p378_p1, %p375_p0 }
   0x7   :  { %383 = shalt.err (!%p380_p2)
}
   0x8   :  { %s384_s30 = scalar_lea.vmem %s20_s22, 256  ;;  %p389_p4 = scmp.lt.s32.totalorder %s20_s22, %s20_s22 }
   0x9   :  { %p385_p3 = scmp.ne.s32.totalorder %s20_s22, %s384_s30  ;;  %p390_p5 = scmp.lt.s32.totalorder %s384_s30, %s384_s30 }
   0xb   :  { %p391_p6 = por %p390_p5, %p389_p4 }
   0xd   :  { %p392_p7 = pnand %p391_p6, %p385_p3 }
   0xf   :  { %395 = shalt.err (!%p392_p7)
}
  0x10   :  { %22 = dma.hbm_to_vmem [thread:$0]  %s508_s0, 256, %s20_s22, [#allocation4]  }
  0x11   :  { %418 = dma.done.wait [#allocation4], 256  }
  0x12   :  { %419 = vsyncadd [#allocation4], 4294967040  ;;  %v423_v0 = vmov 0.0|0.0   ;;  %v424_v1 = vmov 0.0   ;;  %vm425_vm0 = vmmov 0   ;;  %v36_v2 = vld [vmem:[#allocation3] sm:$0xff]  ;;  %v143_v4 = vlaneseq }
  0x13   :  { %355 = vmatprep.subr.bf16.mxu0 %v423_v0  ;;  %345 = vmatprep.subr.mxu1 %v424_v1  ;;  %v37_v3 = vld [vmem:[#allocation3 + $0x8] sm:$0xff]  ;;  %s426_s9 = smov 126   ;;  %v427_v6 = vmov 0   ;;  %v61_v7 = vld [vmem:[%s511_s3] sm:$0xff]  ;;  %s428_s11 = smov 127   ;;  %vm45_vm1 = vcmask 1039360  }
  0x14   :  { %342 = vmatprep.mubr.msk.f32.mxu0 %vm425_vm0, %v424_v1  ;;  %347 = vmatprep.mubr.msk.f32.mxu1 %vm425_vm0, %v424_v1  ;;  %v367_v5 = vpack.i.bf16 %v37_v3, %v36_v2  ;;  %v144_v8 = vshrl.u32 %v143_v4, 7  ;;  %v142_v9 = vld [vmem:[%s509_s1] sm:$0x3]  ;;  %vm53_vm2 = vcmask 1031168   ;;  %vm67_vm3 = vcmask 195584   ;;  %s430_s17 = smov [#allocation6]  }
  0x15   :  { %51 = vrot.lane.b32.xlu1 %v37_v3, %s426_s9  ;;  %373 = vset.pattern.permute.xlu0 %v427_v6  ;;  %v57_v20 = vld [vmem:[%s510_s2] sm:$0xff]  ;;  %v148_v22 = vand.u32 127, %v143_v4  ;;  %v429_v29 = vmov 0.0625   ;;  %vm234_vm7 = vcmask 64512   ;;  %s315_s18 = sshll.u32 %s430_s17, 4  ;;  %s316_s18 = int_to_ptr.vmem [resolvable:$true] %s315_s18 }
  0x16   :  { %372 = vset.pattern.permute.xlu1 %v427_v6  ;;  %368 = vrot.lane.b32.xlu0 %v367_v5, %s428_s11  ;;  %v145_v10 = vmul.u32 18, %v144_v8  ;;  %v226_v28 = vld [vmem:[%s512_s4] sm:$0xff]  ;;  %s396_s4 = scalar_lea.vmem %s316_s18, 32  ;;  %p401_p9 = scmp.lt.s32.totalorder %s316_s18, %s316_s18 }
  0x17   :  { %v326_v32 = vld [vmem:[%s513_s5] ss:$0 sm:$0xff]  ;;  %p397_p8 = scmp.ne.s32.totalorder %s316_s18, %s396_s4  ;;  %p402_p10 = scmp.lt.s32.totalorder %s396_s4, %s396_s4 }
  0x18   :  { %v146_v11 = vadd.s32 %v145_v10, %v142_v9  ;;  %vm149_vm4 = vcmp.ge.s32.totalorder %v148_v22, %v145_v10 }
  0x19   :  { %64 = vperm.xlu1 %372, %v61_v7   ;;  %p403_p11 = por %p402_p10, %p401_p9 }
  0x1a   :  { %49 = vrot.lane.b32.xlu0 %v36_v2, %s426_s9 }
  0x1b   :  { %p404_p12 = pnand %p403_p11, %p397_p8 }
  0x1e   :  { %151 = vperm.xlu0 %373, %v146_v11  }
  0x87   :  { %v52_v17 = vpop.permute.xlu1 %51 }
  0x88   :  { %v369_v12 = vpop.permute.xlu0 %368 }
  0x89   :  { %v371_v13 = vunpack.i.h.bf16 %v369_v12  ;;  %v370_v14 = vunpack.i.l.bf16 %v369_v12 }
  0x8b   :  { %v46_v15 = vsel %vm45_vm1, %v370_v14, %v371_v13 }
  0x8c   :  { %v356_v16 = vpack.c.bf16 %v46_v15, %v36_v2  ;;  %v50_v18 = vpop.permute.xlu0 %49 }
  0x8d   :  { %v54_v19 = vsel %vm53_vm2, %v50_v18, %v52_v17 }
  0x8e   :  { %357 = vmatpush3.bf16.msra.mxu0 %v356_v16 }
  0x8f   :  { %340 = vmatprep.subr.mxu0 %v424_v1 }
  0x92   :  { %341 = vmatpush3.msra.mxu0 %v54_v19 }
  0x93   :  { %343 = vmatmul.mubr.msk.f32.vlgmr.msra.gmra.mrb[0].mxu0 %vm67_vm3, %v57_v20 }
  0x98   :  { %v65_v21 = vpop.permute.xlu1 %64 }
  0x9d   :  { %v152_v23 = vpop.permute.xlu0 %151 }
  0x9e   :  { %vm153_vm5 = vcmp.lt.s32.totalorder %v148_v22, %v152_v23 }
  0x9f   :  { %vm154_vm6 = vmand %vm149_vm4, %vm153_vm5 }
 0x166   :  { %v137_v24 = vpop.f32.mrb[0].mxu0 }
 0x167   :  { %v138_v25 = vadd.f32 %v137_v24, %v65_v21  ;;  %v344_v26 = vpop.f32.mrb[1].mxu0 }
 0x169   :  { %v141_v27 = vmax.f32 %v138_v25, 0.0 }
 0x16b   :  { %346 = vmatpush3.xpose.msra.mxu1 %v141_v27 }
 0x16c   :  { %350 = vmatprep.subr.mxu1 %v424_v1 }
 0x16e   :  { %348 = vmatmul.mubr.msk.f32.vlgmr.msra.gmra.mrb[0].mxu1 %vm154_vm6, %v429_v29 }
 0x16f   :  { %351 = vmatpush3.msra.mxu1 %v226_v28  ;;  %352 = vmatprep.mubr.msk.f32.mxu1 %vm425_vm0, %v424_v1 }
 0x241   :  { %v222_v30 = vpop.f32.mrb[0].mxu1 }
 0x242   :  { %v349_v31 = vpop.f32.mrb[1].mxu1  ;;  %353 = vmatmul.mubr.msk.f32.vlgmr.msra.gmra.mrb[2].mxu1 %vm234_vm7, %v222_v30 }
 0x315   :  { %v304_v33 = vpop.f32.mrb[2].mxu1 }
 0x316   :  { %v305_v34 = vadd.f32 %v326_v32, %v304_v33  ;;  %v354_v35 = vpop.f32.mrb[3].mxu1 }
 0x318   :  { %308 = vst [vmem:[#allocation6] sm:$0x3] %v305_v34 }
 0x319   :  { %407 = shalt.err (!%p404_p12)
}
 0x31a   :  { %s408_s21 = scalar_lea.hbm %s514_s6, 32 }
 0x31b   :  { %p409_p13 = scmp.ne.s32.totalorder %s514_s6, %s408_s21  ;;  %p412_p0 = scmp.lt.u32.totalorder %s408_s21, %s514_s6 }
 0x31d   :  { %p414_p1 = pnand %p412_p0, %p409_p13 }
 0x31f   :  { %417 = shalt.err (!%p414_p1)
}
 0x320   :  { %318 = dma.vmem_to_hbm [thread:$0]  %s316_s18, 32, %s514_s6, [#allocation5]  }
 0x321   :  { %420 = dma.done.wait [#allocation5], 32  }
 0x322   :  { %421 = vsyncadd [#allocation5], 4294967264 }
 0x323   :  { %322 = vsyncpa [#allocation4], 1 }
 0x324   :  { %323 = vsyncpa [#allocation5], 1 }

</bundles_post_ra>
